<compile_context>
chip_gen: v7x
topology: tpu7x:2x2x1
jax: 0.10.0
libtpu: 0.0.40
codegen_flags: <defaults>
</compile_context>

<pallas_src>
import jax
import jax.numpy as jnp
from jax import lax
from jax.experimental import pallas as pl
from jax.experimental.pallas import tpu as pltpu

LEAKY_SLOPE = 0.01  # nn.LeakyReLU() default negative_slope


def _leaky(x):
    return jnp.where(x >= 0, x, LEAKY_SLOPE * x)


# ---------------------------------------------------------------------------
# Fused Pallas kernel: one batch element per grid step
# ---------------------------------------------------------------------------
def _fused_convres_kernel(ee_ref, eo_ref, oe_ref, oo_ref, w1_ref, w2_ref,
                          out_ref, hpad_ref):
    """Refs:
      ee/eo/oe/oo : (1, Ho+1, Wo+1, Cin) f32  -- 4-phase space-to-depth of padded x
      w1          : (9, Cin, out_c)     bf16  -- conv1 weights, tap-major (t = 3i+j)
      w2          : (9, out_c, out_c)   bf16  -- conv2 weights, tap-major
      out         : (1, Ho, Wo, out_c)  f32
      hpad        : VMEM scratch (Ho+2, Wo+2, out_c) f32 -- zero-padded intermediate h
    """
    _, ho, wo, out_c = out_ref.shape
    cin = ee_ref.shape[-1]
    m = ho * wo

    # ---- conv1 (ks=3, stride=2, pad=1): 9 shifted dots over the 4 phases ----
    # stride-2 tap (i, j) maps to phase[(i % 2, j % 2)] at offset (i // 2, j // 2)
    taps1 = ((ee_ref, 0, 0), (eo_ref, 0, 0), (ee_ref, 0, 1),
             (oe_ref, 0, 0), (oo_ref, 0, 0), (oe_ref, 0, 1),
             (ee_ref, 1, 0), (eo_ref, 1, 0), (ee_ref, 1, 1))
    acc1 = jnp.zeros((m, out_c), jnp.float32)
    for t, (pref, a, b) in enumerate(taps1):
        tap = pref[0, a:a + ho, b:b + wo, :].reshape(m, cin).astype(jnp.bfloat16)
        acc1 = acc1 + jnp.dot(tap, w1_ref[t], preferred_element_type=jnp.float32)
    h = _leaky(acc1)                                    # (m, out_c) f32

    # ---- zero-pad h into VMEM scratch (conv2 halo); h never leaves VMEM ----
    hpad_ref[...] = jnp.zeros_like(hpad_ref)
    hpad_ref[1:ho + 1, 1:wo + 1, :] = h.reshape(ho, wo, out_c)

    # ---- conv2 (ks=3, stride=1, pad=1): 9 shifted dots over padded h ----
    acc2 = jnp.zeros((m, out_c), jnp.float32)
    for t in range(9):
        i, j = t // 3, t % 3
        tap = hpad_ref[i:i + ho, j:j + wo, :].reshape(m, out_c).astype(jnp.bfloat16)
        acc2 = acc2 + jnp.dot(tap, w2_ref[t], preferred_element_type=jnp.float32)
    y = _leaky(acc2)

    # Residual add in f32, single store of the output tile.
    # TODO(synk): out_c=8 < 128 lanes -> masked stores; a lane-folding relayout
    # could make this store lane-dense if out_c stays this small at scale.
    out_ref[...] = (h + y).reshape(1, ho, wo, out_c).astype(out_ref.dtype)


# ---------------------------------------------------------------------------
# Wrapper: layout glue (NCHW <-> NHWC, pad, phase split, weight relayout)
# ---------------------------------------------------------------------------
def _weights_tap_major(w_oihw):
    # (O, I, 3, 3) -> (3, 3, I, O) -> (9, I, O); bf16 for the MXU.
    o, i = w_oihw.shape[0], w_oihw.shape[1]
    return jnp.transpose(w_oihw, (2, 3, 1, 0)).reshape(9, i, o).astype(jnp.bfloat16)


@jax.jit
def conv_res_block_forward(x_nchw, w1_oihw, w2_oihw):
    """x: (N, in_c, H, W); w1: (out_c, in_c, 3, 3); w2: (out_c, out_c, 3, 3)."""
    n, cin, hh, ww = x_nchw.shape
    out_c = w1_oihw.shape[0]
    assert hh % 2 == 0 and ww % 2 == 0, "even spatial dims assumed for stride-2 conv"
    ho, wo = hh // 2, ww // 2

    # NCHW -> NHWC, zero-pad by 1, 4-phase space-to-depth.  Pure relayout: total
    # bytes == input bytes (replaces the previous 9x im2col HBM inflation).
    x = jnp.transpose(x_nchw, (0, 2, 3, 1)).astype(jnp.float32)
    xp = jnp.pad(x, ((0, 0), (1, 1), (1, 1), (0, 0)))
    p_ee = xp[:, 0::2, 0::2, :]                         # (N, Ho+1, Wo+1, Cin)
    p_eo = xp[:, 0::2, 1::2, :]
    p_oe = xp[:, 1::2, 0::2, :]
    p_oo = xp[:, 1::2, 1::2, :]

    w1m = _weights_tap_major(w1_oihw)                   # (9, Cin, out_c) bf16
    w2m = _weights_tap_major(w2_oihw)                   # (9, out_c, out_c) bf16

    phase_spec = pl.BlockSpec((1, ho + 1, wo + 1, cin), lambda nb: (nb, 0, 0, 0))
    w1_spec = pl.BlockSpec((9, cin, out_c), lambda nb: (0, 0, 0))
    w2_spec = pl.BlockSpec((9, out_c, out_c), lambda nb: (0, 0, 0))
    out_spec = pl.BlockSpec((1, ho, wo, out_c), lambda nb: (nb, 0, 0, 0))

    # TODO(synk): for large H/W (VMEM pressure, esp. v7x's 64 MiB), additionally
    # tile output rows with a 1-row halo instead of one whole image per grid step.
    out_nhwc = pl.pallas_call(
        _fused_convres_kernel,
        out_shape=jax.ShapeDtypeStruct((n, ho, wo, out_c), jnp.float32),
        grid=(n,),
        in_specs=[phase_spec, phase_spec, phase_spec, phase_spec, w1_spec, w2_spec],
        out_specs=out_spec,
        scratch_shapes=[pltpu.VMEM((ho + 2, wo + 2, out_c), jnp.float32)],
        compiler_params=pltpu.CompilerParams(dimension_semantics=("parallel",)),
    )(p_ee, p_eo, p_oe, p_oo, w1m, w2m)

    return jnp.transpose(out_nhwc, (0, 3, 1, 2))        # back to NCHW


# ---------------------------------------------------------------------------
# Pure-JAX reference (PyTorch semantics, f32) for verification
# ---------------------------------------------------------------------------
def _ref_forward(x, w1, w2):
    dn = ("NCHW", "OIHW", "NCHW")
    y = lax.conv_general_dilated(x, w1, (2, 2), ((1, 1), (1, 1)),
                                 dimension_numbers=dn)
    y = jnp.where(y >= 0, y, LEAKY_SLOPE * y)
    z = lax.conv_general_dilated(y, w2, (1, 1), ((1, 1), (1, 1)),
                                 dimension_numbers=dn)
    z = jnp.where(z >= 0, z, LEAKY_SLOPE * z)
    return y + z


if __name__ == "__main__":
    key = jax.random.PRNGKey(0)
    k_x, k_w1, k_w2 = jax.random.split(key, 3)

    batch, in_c, out_c, H, W = 2, 4, 8, 16, 16
    x = jax.random.normal(k_x, (batch, in_c, H, W), dtype=jnp.float32)
    # Deterministic "kaiming-ish" init (bias=False in the module).
    w1 = jax.random.normal(k_w1, (out_c, in_c, 3, 3), dtype=jnp.float32) * 0.1
    w2 = jax.random.normal(k_w2, (out_c, out_c, 3, 3), dtype=jnp.float32) * 0.1

    out = jax.block_until_ready(conv_res_block_forward(x, w1, w2))
    ref = jax.block_until_ready(_ref_forward(x, w1, w2))

    assert out.shape == (batch, out_c, H // 2, W // 2), out.shape
    # bf16 MXU inputs -> slightly looser tolerance than pure f32 accumulation.
    assert jnp.allclose(out, ref, atol=5e-2, rtol=5e-2), float(
        jnp.max(jnp.abs(out - ref)))

    print("KERNEL_OK")
</pallas_src>

<mosaic_0001>
module attributes {stable_mosaic.version = 11 : i64} {
  func.func @_fused_convres_kernel(%arg0: i32, %arg1: memref<1x9x9x4xf32, #tpu.memory_space<vmem>>, %arg2: memref<1x9x9x4xf32, #tpu.memory_space<vmem>>, %arg3: memref<1x9x9x4xf32, #tpu.memory_space<vmem>>, %arg4: memref<1x9x9x4xf32, #tpu.memory_space<vmem>>, %arg5: memref<9x4x8xbf16, #tpu.memory_space<vmem>>, %arg6: memref<9x8x8xbf16, #tpu.memory_space<vmem>>, %arg7: memref<1x8x8x8xf32, #tpu.memory_space<vmem>>, %arg8: memref<10x10x8xf32, #tpu.memory_space<vmem>>) attributes {dimension_semantics = [#tpu.dimension_semantics<parallel>], iteration_bounds = array<i64: 2>, scalar_prefetch = 0 : i64, scratch_operands = 1 : i64, tpu.core_type = #tpu.core_type<tc>, window_params = [{transform_indices = @transform_0, window_bounds = array<i64: 1, 9, 9, 4>}, {transform_indices = @transform_1, window_bounds = array<i64: 1, 9, 9, 4>}, {transform_indices = @transform_2, window_bounds = array<i64: 1, 9, 9, 4>}, {transform_indices = @transform_3, window_bounds = array<i64: 1, 9, 9, 4>}, {pipeline_mode = #tpu.pipeline_mode<synchronous>, transform_indices = @transform_4, window_bounds = array<i64: 9, 4, 8>}, {pipeline_mode = #tpu.pipeline_mode<synchronous>, transform_indices = @transform_5, window_bounds = array<i64: 9, 8, 8>}, {transform_indices = @transform_6, window_bounds = array<i64: 1, 8, 8, 8>}]} {
    %cst = arith.constant 0.000000e+00 : f32
    %0 = vector.broadcast %cst : f32 to vector<64x8xf32>
    %c0 = arith.constant 0 : index
    %c0_0 = arith.constant 0 : index
    %c0_1 = arith.constant 0 : index
    %c0_2 = arith.constant 0 : index
    %1 = vector.load %arg1[%c0, %c0_0, %c0_1, %c0_2] : memref<1x9x9x4xf32, #tpu.memory_space<vmem>>, vector<1x8x8x4xf32>
    %2 = vector.shape_cast %1 : vector<1x8x8x4xf32> to vector<8x8x4xf32>
    %3 = vector.shape_cast %2 : vector<8x8x4xf32> to vector<64x4xf32>
    %4 = arith.truncf %3 : vector<64x4xf32> to vector<64x4xbf16>
    %c0_3 = arith.constant 0 : index
    %c0_4 = arith.constant 0 : index
    %c0_5 = arith.constant 0 : index
    %5 = vector.load %arg5[%c0_3, %c0_4, %c0_5] : memref<9x4x8xbf16, #tpu.memory_space<vmem>>, vector<1x4x8xbf16>
    %6 = vector.shape_cast %5 : vector<1x4x8xbf16> to vector<4x8xbf16>
    %cst_6 = arith.constant dense<0.000000e+00> : vector<64x8xf32>
    %7 = tpu.matmul %4, %6, %cst_6 {dimension_numbers = #tpu.dot_dimension_numbers<[1], [0], [0], [1], [0, 0, 1, 1], [], []>} : vector<64x4xbf16>, vector<4x8xbf16>, vector<64x8xf32> -> vector<64x8xf32>
    %8 = arith.addf %0, %7 : vector<64x8xf32>
    %c0_7 = arith.constant 0 : index
    %c0_8 = arith.constant 0 : index
    %c0_9 = arith.constant 0 : index
    %c0_10 = arith.constant 0 : index
    %9 = vector.load %arg2[%c0_7, %c0_8, %c0_9, %c0_10] : memref<1x9x9x4xf32, #tpu.memory_space<vmem>>, vector<1x8x8x4xf32>
    %10 = vector.shape_cast %9 : vector<1x8x8x4xf32> to vector<8x8x4xf32>
    %11 = vector.shape_cast %10 : vector<8x8x4xf32> to vector<64x4xf32>
    %12 = arith.truncf %11 : vector<64x4xf32> to vector<64x4xbf16>
    %c1 = arith.constant 1 : index
    %c0_11 = arith.constant 0 : index
    %c0_12 = arith.constant 0 : index
    %13 = vector.load %arg5[%c1, %c0_11, %c0_12] : memref<9x4x8xbf16, #tpu.memory_space<vmem>>, vector<1x4x8xbf16>
    %14 = vector.shape_cast %13 : vector<1x4x8xbf16> to vector<4x8xbf16>
    %cst_13 = arith.constant dense<0.000000e+00> : vector<64x8xf32>
    %15 = tpu.matmul %12, %14, %cst_13 {dimension_numbers = #tpu.dot_dimension_numbers<[1], [0], [0], [1], [0, 0, 1, 1], [], []>} : vector<64x4xbf16>, vector<4x8xbf16>, vector<64x8xf32> -> vector<64x8xf32>
    %16 = arith.addf %8, %15 : vector<64x8xf32>
    %c0_14 = arith.constant 0 : index
    %c0_15 = arith.constant 0 : index
    %c1_16 = arith.constant 1 : index
    %c0_17 = arith.constant 0 : index
    %17 = vector.load %arg1[%c0_14, %c0_15, %c1_16, %c0_17] : memref<1x9x9x4xf32, #tpu.memory_space<vmem>>, vector<1x8x8x4xf32>
    %18 = vector.shape_cast %17 : vector<1x8x8x4xf32> to vector<8x8x4xf32>
    %19 = vector.shape_cast %18 : vector<8x8x4xf32> to vector<64x4xf32>
    %20 = arith.truncf %19 : vector<64x4xf32> to vector<64x4xbf16>
    %c2 = arith.constant 2 : index
    %c0_18 = arith.constant 0 : index
    %c0_19 = arith.constant 0 : index
    %21 = vector.load %arg5[%c2, %c0_18, %c0_19] : memref<9x4x8xbf16, #tpu.memory_space<vmem>>, vector<1x4x8xbf16>
    %22 = vector.shape_cast %21 : vector<1x4x8xbf16> to vector<4x8xbf16>
    %cst_20 = arith.constant dense<0.000000e+00> : vector<64x8xf32>
    %23 = tpu.matmul %20, %22, %cst_20 {dimension_numbers = #tpu.dot_dimension_numbers<[1], [0], [0], [1], [0, 0, 1, 1], [], []>} : vector<64x4xbf16>, vector<4x8xbf16>, vector<64x8xf32> -> vector<64x8xf32>
    %24 = arith.addf %16, %23 : vector<64x8xf32>
    %c0_21 = arith.constant 0 : index
    %c0_22 = arith.constant 0 : index
    %c0_23 = arith.constant 0 : index
    %c0_24 = arith.constant 0 : index
    %25 = vector.load %arg3[%c0_21, %c0_22, %c0_23, %c0_24] : memref<1x9x9x4xf32, #tpu.memory_space<vmem>>, vector<1x8x8x4xf32>
    %26 = vector.shape_cast %25 : vector<1x8x8x4xf32> to vector<8x8x4xf32>
    %27 = vector.shape_cast %26 : vector<8x8x4xf32> to vector<64x4xf32>
    %28 = arith.truncf %27 : vector<64x4xf32> to vector<64x4xbf16>
    %c3 = arith.constant 3 : index
    %c0_25 = arith.constant 0 : index
    %c0_26 = arith.constant 0 : index
    %29 = vector.load %arg5[%c3, %c0_25, %c0_26] : memref<9x4x8xbf16, #tpu.memory_space<vmem>>, vector<1x4x8xbf16>
    %30 = vector.shape_cast %29 : vector<1x4x8xbf16> to vector<4x8xbf16>
    %cst_27 = arith.constant dense<0.000000e+00> : vector<64x8xf32>
    %31 = tpu.matmul %28, %30, %cst_27 {dimension_numbers = #tpu.dot_dimension_numbers<[1], [0], [0], [1], [0, 0, 1, 1], [], []>} : vector<64x4xbf16>, vector<4x8xbf16>, vector<64x8xf32> -> vector<64x8xf32>
    %32 = arith.addf %24, %31 : vector<64x8xf32>
    %c0_28 = arith.constant 0 : index
    %c0_29 = arith.constant 0 : index
    %c0_30 = arith.constant 0 : index
    %c0_31 = arith.constant 0 : index
    %33 = vector.load %arg4[%c0_28, %c0_29, %c0_30, %c0_31] : memref<1x9x9x4xf32, #tpu.memory_space<vmem>>, vector<1x8x8x4xf32>
    %34 = vector.shape_cast %33 : vector<1x8x8x4xf32> to vector<8x8x4xf32>
    %35 = vector.shape_cast %34 : vector<8x8x4xf32> to vector<64x4xf32>
    %36 = arith.truncf %35 : vector<64x4xf32> to vector<64x4xbf16>
    %c4 = arith.constant 4 : index
    %c0_32 = arith.constant 0 : index
    %c0_33 = arith.constant 0 : index
    %37 = vector.load %arg5[%c4, %c0_32, %c0_33] : memref<9x4x8xbf16, #tpu.memory_space<vmem>>, vector<1x4x8xbf16>
    %38 = vector.shape_cast %37 : vector<1x4x8xbf16> to vector<4x8xbf16>
    %cst_34 = arith.constant dense<0.000000e+00> : vector<64x8xf32>
    %39 = tpu.matmul %36, %38, %cst_34 {dimension_numbers = #tpu.dot_dimension_numbers<[1], [0], [0], [1], [0, 0, 1, 1], [], []>} : vector<64x4xbf16>, vector<4x8xbf16>, vector<64x8xf32> -> vector<64x8xf32>
    %40 = arith.addf %32, %39 : vector<64x8xf32>
    %c0_35 = arith.constant 0 : index
    %c0_36 = arith.constant 0 : index
    %c1_37 = arith.constant 1 : index
    %c0_38 = arith.constant 0 : index
    %41 = vector.load %arg3[%c0_35, %c0_36, %c1_37, %c0_38] : memref<1x9x9x4xf32, #tpu.memory_space<vmem>>, vector<1x8x8x4xf32>
    %42 = vector.shape_cast %41 : vector<1x8x8x4xf32> to vector<8x8x4xf32>
    %43 = vector.shape_cast %42 : vector<8x8x4xf32> to vector<64x4xf32>
    %44 = arith.truncf %43 : vector<64x4xf32> to vector<64x4xbf16>
    %c5 = arith.constant 5 : index
    %c0_39 = arith.constant 0 : index
    %c0_40 = arith.constant 0 : index
    %45 = vector.load %arg5[%c5, %c0_39, %c0_40] : memref<9x4x8xbf16, #tpu.memory_space<vmem>>, vector<1x4x8xbf16>
    %46 = vector.shape_cast %45 : vector<1x4x8xbf16> to vector<4x8xbf16>
    %cst_41 = arith.constant dense<0.000000e+00> : vector<64x8xf32>
    %47 = tpu.matmul %44, %46, %cst_41 {dimension_numbers = #tpu.dot_dimension_numbers<[1], [0], [0], [1], [0, 0, 1, 1], [], []>} : vector<64x4xbf16>, vector<4x8xbf16>, vector<64x8xf32> -> vector<64x8xf32>
    %48 = arith.addf %40, %47 : vector<64x8xf32>
    %c0_42 = arith.constant 0 : index
    %c1_43 = arith.constant 1 : index
    %c0_44 = arith.constant 0 : index
    %c0_45 = arith.constant 0 : index
    %49 = vector.load %arg1[%c0_42, %c1_43, %c0_44, %c0_45] : memref<1x9x9x4xf32, #tpu.memory_space<vmem>>, vector<1x8x8x4xf32>
    %50 = vector.shape_cast %49 : vector<1x8x8x4xf32> to vector<8x8x4xf32>
    %51 = vector.shape_cast %50 : vector<8x8x4xf32> to vector<64x4xf32>
    %52 = arith.truncf %51 : vector<64x4xf32> to vector<64x4xbf16>
    %c6 = arith.constant 6 : index
    %c0_46 = arith.constant 0 : index
    %c0_47 = arith.constant 0 : index
    %53 = vector.load %arg5[%c6, %c0_46, %c0_47] : memref<9x4x8xbf16, #tpu.memory_space<vmem>>, vector<1x4x8xbf16>
    %54 = vector.shape_cast %53 : vector<1x4x8xbf16> to vector<4x8xbf16>
    %cst_48 = arith.constant dense<0.000000e+00> : vector<64x8xf32>
    %55 = tpu.matmul %52, %54, %cst_48 {dimension_numbers = #tpu.dot_dimension_numbers<[1], [0], [0], [1], [0, 0, 1, 1], [], []>} : vector<64x4xbf16>, vector<4x8xbf16>, vector<64x8xf32> -> vector<64x8xf32>
    %56 = arith.addf %48, %55 : vector<64x8xf32>
    %c0_49 = arith.constant 0 : index
    %c1_50 = arith.constant 1 : index
    %c0_51 = arith.constant 0 : index
    %c0_52 = arith.constant 0 : index
    %57 = vector.load %arg2[%c0_49, %c1_50, %c0_51, %c0_52] : memref<1x9x9x4xf32, #tpu.memory_space<vmem>>, vector<1x8x8x4xf32>
    %58 = vector.shape_cast %57 : vector<1x8x8x4xf32> to vector<8x8x4xf32>
    %59 = vector.shape_cast %58 : vector<8x8x4xf32> to vector<64x4xf32>
    %60 = arith.truncf %59 : vector<64x4xf32> to vector<64x4xbf16>
    %c7 = arith.constant 7 : index
    %c0_53 = arith.constant 0 : index
    %c0_54 = arith.constant 0 : index
    %61 = vector.load %arg5[%c7, %c0_53, %c0_54] : memref<9x4x8xbf16, #tpu.memory_space<vmem>>, vector<1x4x8xbf16>
    %62 = vector.shape_cast %61 : vector<1x4x8xbf16> to vector<4x8xbf16>
    %cst_55 = arith.constant dense<0.000000e+00> : vector<64x8xf32>
    %63 = tpu.matmul %60, %62, %cst_55 {dimension_numbers = #tpu.dot_dimension_numbers<[1], [0], [0], [1], [0, 0, 1, 1], [], []>} : vector<64x4xbf16>, vector<4x8xbf16>, vector<64x8xf32> -> vector<64x8xf32>
    %64 = arith.addf %56, %63 : vector<64x8xf32>
    %c0_56 = arith.constant 0 : index
    %c1_57 = arith.constant 1 : index
    %c1_58 = arith.constant 1 : index
    %c0_59 = arith.constant 0 : index
    %65 = vector.load %arg1[%c0_56, %c1_57, %c1_58, %c0_59] : memref<1x9x9x4xf32, #tpu.memory_space<vmem>>, vector<1x8x8x4xf32>
    %66 = vector.shape_cast %65 : vector<1x8x8x4xf32> to vector<8x8x4xf32>
    %67 = vector.shape_cast %66 : vector<8x8x4xf32> to vector<64x4xf32>
    %68 = arith.truncf %67 : vector<64x4xf32> to vector<64x4xbf16>
    %c8 = arith.constant 8 : index
    %c0_60 = arith.constant 0 : index
    %c0_61 = arith.constant 0 : index
    %69 = vector.load %arg5[%c8, %c0_60, %c0_61] : memref<9x4x8xbf16, #tpu.memory_space<vmem>>, vector<1x4x8xbf16>
    %70 = vector.shape_cast %69 : vector<1x4x8xbf16> to vector<4x8xbf16>
    %cst_62 = arith.constant dense<0.000000e+00> : vector<64x8xf32>
    %71 = tpu.matmul %68, %70, %cst_62 {dimension_numbers = #tpu.dot_dimension_numbers<[1], [0], [0], [1], [0, 0, 1, 1], [], []>} : vector<64x4xbf16>, vector<4x8xbf16>, vector<64x8xf32> -> vector<64x8xf32>
    %72 = arith.addf %64, %71 : vector<64x8xf32>
    %cst_63 = arith.constant 0.000000e+00 : f32
    %73 = vector.broadcast %cst_63 : f32 to vector<64x8xf32>
    %74 = arith.cmpf oge, %72, %73 : vector<64x8xf32>
    %cst_64 = arith.constant 0.00999999977 : f32
    %75 = vector.broadcast %cst_64 : f32 to vector<64x8xf32>
    %76 = arith.mulf %75, %72 : vector<64x8xf32>
    %77 = arith.select %74, %72, %76 : vector<64x8xi1>, vector<64x8xf32>
    %cst_65 = arith.constant 0.000000e+00 : f32
    %78 = vector.broadcast %cst_65 : f32 to vector<10x10x8xf32>
    %c0_66 = arith.constant 0 : index
    %c0_67 = arith.constant 0 : index
    %c0_68 = arith.constant 0 : index
    %79 = vector.load %arg8[%c0_66, %c0_67, %c0_68] : memref<10x10x8xf32, #tpu.memory_space<vmem>>, vector<10x10x8xf32>
    tpu.vector_store %arg8[%c0_66, %c0_67, %c0_68], %78 {strides = array<i32>} : memref<10x10x8xf32, #tpu.memory_space<vmem>>, vector<10x10x8xf32>,
    %80 = vector.shape_cast %77 : vector<64x8xf32> to vector<8x8x8xf32>
    %c1_69 = arith.constant 1 : index
    %c1_70 = arith.constant 1 : index
    %c0_71 = arith.constant 0 : index
    %81 = vector.load %arg8[%c1_69, %c1_70, %c0_71] : memref<10x10x8xf32, #tpu.memory_space<vmem>>, vector<8x8x8xf32>
    tpu.vector_store %arg8[%c1_69, %c1_70, %c0_71], %80 {strides = array<i32>} : memref<10x10x8xf32, #tpu.memory_space<vmem>>, vector<8x8x8xf32>,
    %cst_72 = arith.constant 0.000000e+00 : f32
    %82 = vector.broadcast %cst_72 : f32 to vector<64x8xf32>
    %c0_73 = arith.constant 0 : index
    %c0_74 = arith.constant 0 : index
    %c0_75 = arith.constant 0 : index
    %83 = vector.load %arg8[%c0_73, %c0_74, %c0_75] : memref<10x10x8xf32, #tpu.memory_space<vmem>>, vector<8x8x8xf32>
    %84 = vector.shape_cast %83 : vector<8x8x8xf32> to vector<64x8xf32>
    %85 = arith.truncf %84 : vector<64x8xf32> to vector<64x8xbf16>
    %c0_76 = arith.constant 0 : index
    %c0_77 = arith.constant 0 : index
    %c0_78 = arith.constant 0 : index
    %86 = vector.load %arg6[%c0_76, %c0_77, %c0_78] : memref<9x8x8xbf16, #tpu.memory_space<vmem>>, vector<1x8x8xbf16>
    %87 = vector.shape_cast %86 : vector<1x8x8xbf16> to vector<8x8xbf16>
    %cst_79 = arith.constant dense<0.000000e+00> : vector<64x8xf32>
    %88 = tpu.matmul %85, %87, %cst_79 {dimension_numbers = #tpu.dot_dimension_numbers<[1], [0], [0], [1], [0, 0, 1, 1], [], []>} : vector<64x8xbf16>, vector<8x8xbf16>, vector<64x8xf32> -> vector<64x8xf32>
    %89 = arith.addf %82, %88 : vector<64x8xf32>
    %c0_80 = arith.constant 0 : index
    %c1_81 = arith.constant 1 : index
    %c0_82 = arith.constant 0 : index
    %90 = vector.load %arg8[%c0_80, %c1_81, %c0_82] : memref<10x10x8xf32, #tpu.memory_space<vmem>>, vector<8x8x8xf32>
    %91 = vector.shape_cast %90 : vector<8x8x8xf32> to vector<64x8xf32>
    %92 = arith.truncf %91 : vector<64x8xf32> to vector<64x8xbf16>
    %c1_83 = arith.constant 1 : index
    %c0_84 = arith.constant 0 : index
    %c0_85 = arith.constant 0 : index
    %93 = vector.load %arg6[%c1_83, %c0_84, %c0_85] : memref<9x8x8xbf16, #tpu.memory_space<vmem>>, vector<1x8x8xbf16>
    %94 = vector.shape_cast %93 : vector<1x8x8xbf16> to vector<8x8xbf16>
    %cst_86 = arith.constant dense<0.000000e+00> : vector<64x8xf32>
    %95 = tpu.matmul %92, %94, %cst_86 {dimension_numbers = #tpu.dot_dimension_numbers<[1], [0], [0], [1], [0, 0, 1, 1], [], []>} : vector<64x8xbf16>, vector<8x8xbf16>, vector<64x8xf32> -> vector<64x8xf32>
    %96 = arith.addf %89, %95 : vector<64x8xf32>
    %c0_87 = arith.constant 0 : index
    %c2_88 = arith.constant 2 : index
    %c0_89 = arith.constant 0 : index
    %97 = vector.load %arg8[%c0_87, %c2_88, %c0_89] : memref<10x10x8xf32, #tpu.memory_space<vmem>>, vector<8x8x8xf32>
    %98 = vector.shape_cast %97 : vector<8x8x8xf32> to vector<64x8xf32>
    %99 = arith.truncf %98 : vector<64x8xf32> to vector<64x8xbf16>
    %c2_90 = arith.constant 2 : index
    %c0_91 = arith.constant 0 : index
    %c0_92 = arith.constant 0 : index
    %100 = vector.load %arg6[%c2_90, %c0_91, %c0_92] : memref<9x8x8xbf16, #tpu.memory_space<vmem>>, vector<1x8x8xbf16>
    %101 = vector.shape_cast %100 : vector<1x8x8xbf16> to vector<8x8xbf16>
    %cst_93 = arith.constant dense<0.000000e+00> : vector<64x8xf32>
    %102 = tpu.matmul %99, %101, %cst_93 {dimension_numbers = #tpu.dot_dimension_numbers<[1], [0], [0], [1], [0, 0, 1, 1], [], []>} : vector<64x8xbf16>, vector<8x8xbf16>, vector<64x8xf32> -> vector<64x8xf32>
    %103 = arith.addf %96, %102 : vector<64x8xf32>
    %c1_94 = arith.constant 1 : index
    %c0_95 = arith.constant 0 : index
    %c0_96 = arith.constant 0 : index
    %104 = vector.load %arg8[%c1_94, %c0_95, %c0_96] : memref<10x10x8xf32, #tpu.memory_space<vmem>>, vector<8x8x8xf32>
    %105 = vector.shape_cast %104 : vector<8x8x8xf32> to vector<64x8xf32>
    %106 = arith.truncf %105 : vector<64x8xf32> to vector<64x8xbf16>
    %c3_97 = arith.constant 3 : index
    %c0_98 = arith.constant 0 : index
    %c0_99 = arith.constant 0 : index
    %107 = vector.load %arg6[%c3_97, %c0_98, %c0_99] : memref<9x8x8xbf16, #tpu.memory_space<vmem>>, vector<1x8x8xbf16>
    %108 = vector.shape_cast %107 : vector<1x8x8xbf16> to vector<8x8xbf16>
    %cst_100 = arith.constant dense<0.000000e+00> : vector<64x8xf32>
    %109 = tpu.matmul %106, %108, %cst_100 {dimension_numbers = #tpu.dot_dimension_numbers<[1], [0], [0], [1], [0, 0, 1, 1], [], []>} : vector<64x8xbf16>, vector<8x8xbf16>, vector<64x8xf32> -> vector<64x8xf32>
    %110 = arith.addf %103, %109 : vector<64x8xf32>
    %c1_101 = arith.constant 1 : index
    %c1_102 = arith.constant 1 : index
    %c0_103 = arith.constant 0 : index
    %111 = vector.load %arg8[%c1_101, %c1_102, %c0_103] : memref<10x10x8xf32, #tpu.memory_space<vmem>>, vector<8x8x8xf32>
    %112 = vector.shape_cast %111 : vector<8x8x8xf32> to vector<64x8xf32>
    %113 = arith.truncf %112 : vector<64x8xf32> to vector<64x8xbf16>
    %c4_104 = arith.constant 4 : index
    %c0_105 = arith.constant 0 : index
    %c0_106 = arith.constant 0 : index
    %114 = vector.load %arg6[%c4_104, %c0_105, %c0_106] : memref<9x8x8xbf16, #tpu.memory_space<vmem>>, vector<1x8x8xbf16>
    %115 = vector.shape_cast %114 : vector<1x8x8xbf16> to vector<8x8xbf16>
    %cst_107 = arith.constant dense<0.000000e+00> : vector<64x8xf32>
    %116 = tpu.matmul %113, %115, %cst_107 {dimension_numbers = #tpu.dot_dimension_numbers<[1], [0], [0], [1], [0, 0, 1, 1], [], []>} : vector<64x8xbf16>, vector<8x8xbf16>, vector<64x8xf32> -> vector<64x8xf32>
    %117 = arith.addf %110, %116 : vector<64x8xf32>
    %c1_108 = arith.constant 1 : index
    %c2_109 = arith.constant 2 : index
    %c0_110 = arith.constant 0 : index
    %118 = vector.load %arg8[%c1_108, %c2_109, %c0_110] : memref<10x10x8xf32, #tpu.memory_space<vmem>>, vector<8x8x8xf32>
    %119 = vector.shape_cast %118 : vector<8x8x8xf32> to vector<64x8xf32>
    %120 = arith.truncf %119 : vector<64x8xf32> to vector<64x8xbf16>
    %c5_111 = arith.constant 5 : index
    %c0_112 = arith.constant 0 : index
    %c0_113 = arith.constant 0 : index
    %121 = vector.load %arg6[%c5_111, %c0_112, %c0_113] : memref<9x8x8xbf16, #tpu.memory_space<vmem>>, vector<1x8x8xbf16>
    %122 = vector.shape_cast %121 : vector<1x8x8xbf16> to vector<8x8xbf16>
    %cst_114 = arith.constant dense<0.000000e+00> : vector<64x8xf32>
    %123 = tpu.matmul %120, %122, %cst_114 {dimension_numbers = #tpu.dot_dimension_numbers<[1], [0], [0], [1], [0, 0, 1, 1], [], []>} : vector<64x8xbf16>, vector<8x8xbf16>, vector<64x8xf32> -> vector<64x8xf32>
    %124 = arith.addf %117, %123 : vector<64x8xf32>
    %c2_115 = arith.constant 2 : index
    %c0_116 = arith.constant 0 : index
    %c0_117 = arith.constant 0 : index
    %125 = vector.load %arg8[%c2_115, %c0_116, %c0_117] : memref<10x10x8xf32, #tpu.memory_space<vmem>>, vector<8x8x8xf32>
    %126 = vector.shape_cast %125 : vector<8x8x8xf32> to vector<64x8xf32>
    %127 = arith.truncf %126 : vector<64x8xf32> to vector<64x8xbf16>
    %c6_118 = arith.constant 6 : index
    %c0_119 = arith.constant 0 : index
    %c0_120 = arith.constant 0 : index
    %128 = vector.load %arg6[%c6_118, %c0_119, %c0_120] : memref<9x8x8xbf16, #tpu.memory_space<vmem>>, vector<1x8x8xbf16>
    %129 = vector.shape_cast %128 : vector<1x8x8xbf16> to vector<8x8xbf16>
    %cst_121 = arith.constant dense<0.000000e+00> : vector<64x8xf32>
    %130 = tpu.matmul %127, %129, %cst_121 {dimension_numbers = #tpu.dot_dimension_numbers<[1], [0], [0], [1], [0, 0, 1, 1], [], []>} : vector<64x8xbf16>, vector<8x8xbf16>, vector<64x8xf32> -> vector<64x8xf32>
    %131 = arith.addf %124, %130 : vector<64x8xf32>
    %c2_122 = arith.constant 2 : index
    %c1_123 = arith.constant 1 : index
    %c0_124 = arith.constant 0 : index
    %132 = vector.load %arg8[%c2_122, %c1_123, %c0_124] : memref<10x10x8xf32, #tpu.memory_space<vmem>>, vector<8x8x8xf32>
    %133 = vector.shape_cast %132 : vector<8x8x8xf32> to vector<64x8xf32>
    %134 = arith.truncf %133 : vector<64x8xf32> to vector<64x8xbf16>
    %c7_125 = arith.constant 7 : index
    %c0_126 = arith.constant 0 : index
    %c0_127 = arith.constant 0 : index
    %135 = vector.load %arg6[%c7_125, %c0_126, %c0_127] : memref<9x8x8xbf16, #tpu.memory_space<vmem>>, vector<1x8x8xbf16>
    %136 = vector.shape_cast %135 : vector<1x8x8xbf16> to vector<8x8xbf16>
    %cst_128 = arith.constant dense<0.000000e+00> : vector<64x8xf32>
    %137 = tpu.matmul %134, %136, %cst_128 {dimension_numbers = #tpu.dot_dimension_numbers<[1], [0], [0], [1], [0, 0, 1, 1], [], []>} : vector<64x8xbf16>, vector<8x8xbf16>, vector<64x8xf32> -> vector<64x8xf32>
    %138 = arith.addf %131, %137 : vector<64x8xf32>
    %c2_129 = arith.constant 2 : index
    %c2_130 = arith.constant 2 : index
    %c0_131 = arith.constant 0 : index
    %139 = vector.load %arg8[%c2_129, %c2_130, %c0_131] : memref<10x10x8xf32, #tpu.memory_space<vmem>>, vector<8x8x8xf32>
    %140 = vector.shape_cast %139 : vector<8x8x8xf32> to vector<64x8xf32>
    %141 = arith.truncf %140 : vector<64x8xf32> to vector<64x8xbf16>
    %c8_132 = arith.constant 8 : index
    %c0_133 = arith.constant 0 : index
    %c0_134 = arith.constant 0 : index
    %142 = vector.load %arg6[%c8_132, %c0_133, %c0_134] : memref<9x8x8xbf16, #tpu.memory_space<vmem>>, vector<1x8x8xbf16>
    %143 = vector.shape_cast %142 : vector<1x8x8xbf16> to vector<8x8xbf16>
    %cst_135 = arith.constant dense<0.000000e+00> : vector<64x8xf32>
    %144 = tpu.matmul %141, %143, %cst_135 {dimension_numbers = #tpu.dot_dimension_numbers<[1], [0], [0], [1], [0, 0, 1, 1], [], []>} : vector<64x8xbf16>, vector<8x8xbf16>, vector<64x8xf32> -> vector<64x8xf32>
    %145 = arith.addf %138, %144 : vector<64x8xf32>
    %cst_136 = arith.constant 0.000000e+00 : f32
    %146 = vector.broadcast %cst_136 : f32 to vector<64x8xf32>
    %147 = arith.cmpf oge, %145, %146 : vector<64x8xf32>
    %cst_137 = arith.constant 0.00999999977 : f32
    %148 = vector.broadcast %cst_137 : f32 to vector<64x8xf32>
    %149 = arith.mulf %148, %145 : vector<64x8xf32>
    %150 = arith.select %147, %145, %149 : vector<64x8xi1>, vector<64x8xf32>
    %151 = arith.addf %77, %150 : vector<64x8xf32>
    %152 = vector.shape_cast %151 : vector<64x8xf32> to vector<1x8x8x8xf32>
    %c0_138 = arith.constant 0 : index
    %c0_139 = arith.constant 0 : index
    %c0_140 = arith.constant 0 : index
    %c0_141 = arith.constant 0 : index
    %153 = vector.load %arg7[%c0_138, %c0_139, %c0_140, %c0_141] : memref<1x8x8x8xf32, #tpu.memory_space<vmem>>, vector<1x8x8x8xf32>
    tpu.vector_store %arg7[%c0_138, %c0_139, %c0_140, %c0_141], %152 {strides = array<i32>} : memref<1x8x8x8xf32, #tpu.memory_space<vmem>>, vector<1x8x8x8xf32>,
    return
  }
  func.func @transform_0(%arg0: i32) -> (i32, i32, i32, i32) {
    %c0_i32 = arith.constant 0 : i32
    %c0_i32_0 = arith.constant 0 : i32
    %c0_i32_1 = arith.constant 0 : i32
    %c0_i32_2 = arith.constant 0 : i32
    return %arg0, %c0_i32, %c0_i32_0, %c0_i32_1 : i32, i32, i32, i32
  }
  func.func @transform_1(%arg0: i32) -> (i32, i32, i32, i32) {
    %c0_i32 = arith.constant 0 : i32
    %c0_i32_0 = arith.constant 0 : i32
    %c0_i32_1 = arith.constant 0 : i32
    %c0_i32_2 = arith.constant 0 : i32
    return %arg0, %c0_i32, %c0_i32_0, %c0_i32_1 : i32, i32, i32, i32
  }
  func.func @transform_2(%arg0: i32) -> (i32, i32, i32, i32) {
    %c0_i32 = arith.constant 0 : i32
    %c0_i32_0 = arith.constant 0 : i32
    %c0_i32_1 = arith.constant 0 : i32
    %c0_i32_2 = arith.constant 0 : i32
    return %arg0, %c0_i32, %c0_i32_0, %c0_i32_1 : i32, i32, i32, i32
  }
  func.func @transform_3(%arg0: i32) -> (i32, i32, i32, i32) {
    %c0_i32 = arith.constant 0 : i32
    %c0_i32_0 = arith.constant 0 : i32
    %c0_i32_1 = arith.constant 0 : i32
    %c0_i32_2 = arith.constant 0 : i32
    return %arg0, %c0_i32, %c0_i32_0, %c0_i32_1 : i32, i32, i32, i32
  }
  func.func @transform_4(%arg0: i32) -> (i32, i32, i32) {
    %c0_i32 = arith.constant 0 : i32
    %c0_i32_0 = arith.constant 0 : i32
    %c0_i32_1 = arith.constant 0 : i32
    %c0_i32_2 = arith.constant 0 : i32
    return %c0_i32, %c0_i32_0, %c0_i32_1 : i32, i32, i32
  }
  func.func @transform_5(%arg0: i32) -> (i32, i32, i32) {
    %c0_i32 = arith.constant 0 : i32
    %c0_i32_0 = arith.constant 0 : i32
    %c0_i32_1 = arith.constant 0 : i32
    %c0_i32_2 = arith.constant 0 : i32
    return %c0_i32, %c0_i32_0, %c0_i32_1 : i32, i32, i32
  }
  func.func @transform_6(%arg0: i32) -> (i32, i32, i32, i32) {
    %c0_i32 = arith.constant 0 : i32
    %c0_i32_0 = arith.constant 0 : i32
    %c0_i32_1 = arith.constant 0 : i32
    %c0_i32_2 = arith.constant 0 : i32
    return %arg0, %c0_i32, %c0_i32_0, %c0_i32_1 : i32, i32, i32, i32
  }
}

</mosaic_0001>

<bundles_post_ra>
// kernel: conv_res_block_forward.1
= control target key start
LH: loop header
LB: loop body
LE: loop exit
PB: predicated region body
PF: predicated region fallthrough
CT: control target
= control target key end

     0   :  { %s2903_s21 = smov 0   ;;  %s3417_s0 = inlined_call_operand.vmem [shape: f32[2,9,9,4], index: 0, kind: input, shape index: {}]   ;;  %s3418_s1 = inlined_call_operand.vmem [shape: f32[2,9,9,4], index: 1, kind: input, shape index: {}]   ;;  %s3419_s2 = inlined_call_operand.vmem [shape: f32[2,9,9,4], index: 2, kind: input, shape index: {}]   ;;  %s3420_s3 = inlined_call_operand.vmem [shape: f32[2,9,9,4], index: 3, kind: input, shape index: {}]   ;;  %s3421_s4 = inlined_call_operand.vmem [shape: bf16[9,4,8], index: 4, kind: input, shape index: {}]   ;;  %s3422_s5 = inlined_call_operand.vmem [shape: bf16[9,8,8], index: 5, kind: input, shape index: {}]   ;;  %s3423_s6 = inlined_call_operand.vmem [shape: f32[2,8,8,8], index: 6, kind: output, shape index: {}]  }
   0x1 LB: > { %s2307_s22 = sadd.s32 4294967295, %s2865_s21   ;;  %p2311_p0 = scmp.ge.s32.totalorder %s2865_s21, 1  ;;  %s2865_s21 = sphi %s2903_s21, %s16_s21  }
   0x2   : > { %p242_p1 = scmp.lt.s32.totalorder %s2865_s21, 3 }
   0x4   : > { %p243_p2 = pnand %p2311_p0, %p242_p1 }
   0x5   : > { %v2318_v0 = vld [vmem:[%s3421_s4 + $0x2] sm:$0x3] (!%p243_p2)  ;;  %vm353_vm0 = vcmask (!%p243_p2), 1041408   ;;  %p287_p3 = scmp.lt.s32.totalorder (!%p243_p2), %s2307_s22, 1  ;;  %v325_v2 = vld [vmem:[%s3421_s4] sm:$0x3] (!%p243_p2) }
   0x6   : > { %246 = sbr.rel (%p243_p2) target bundleno = 734 (0x2de), region = 44  ;;  %2831 = vmatprep.subr.msk.bf16.mxu0 (!%p243_p2), %vm353_vm0, %v2318_v0  ;;  %v355_v1 = vsel (!%p243_p2), %vm353_vm0, %v2318_v0, 0  ;;  %vm340_vm1 = vcmask (!%p243_p2), 31744   ;;  %v435_v12 = vsel (!%p243_p2), %vm353_vm0, %v325_v2, 0  ;;  %v2327_v15 = vld [vmem:[%s3421_s4 + $0x4] sm:$0x3] (!%p243_p2) }
   0x7   : > { %2524 = vmatpush3.bf16.msra.mxu0 (!%p243_p2), %v355_v1  ;;  %v529_v50 = vsel (!%p243_p2), %vm353_vm0, %v2327_v15, 0  ;;  %v2332_v51 = vld [vmem:[%s3421_s4 + $0x6] sm:$0x3] (!%p243_p2)  ;;  %v2337_v58 = vld [vmem:[%s3421_s4 + $0x8] sm:$0x3] (!%p243_p2)  ;;  %vm1242_vm2 = vcmask (!%p243_p2), 64512  }
   0x8   : > { %2832 = vmatprep.subr.msk.bf16.mxu0 (!%p243_p2), %vm353_vm0, %v325_v2  ;;  %v631_v57 = vsel (!%p243_p2), %vm353_vm0, %v2332_v51, 0  ;;  %vm1244_vm3 = vcmask (!%p243_p2), 58368   ;;  %vm1312_vm4 = vcmask (!%p243_p2), 1043456  }
   0xd   : > { %s3425_s22 = smov (!%p287_p3, %s2307_s22), 1 }
   0xe   : > { %s2923_s27 = smul.u32 144, %s3425_s22  ;;  %s2432_s28 = sshll.u32 %s3425_s22, 6 }
   0xf   : > { %s3388_s7 = scalar_lea.vmem %s3423_s6, %s2432_s28 }
  0x10   : > { %s2929_s30 = scalar_lea.vmem %s3418_s1, %s2923_s27  ;;  %s2935_s9 = scalar_lea.vmem %s3417_s0, %s2923_s27 }
  0x11   : > { %v326_v3 = vld [vmem:[%s2929_s30] sm:$0xff]  ;;  %v2939_v4 = vld [vmem:[%s2929_s30 + $0x10] sm:$0xff]  ;;  %s3079_s16 = scalar_lea.vmem %s3419_s2, %s2923_s27  ;;  %s306_s23 = scalar_lea.vmem %s3420_s3, %s2923_s27 }
  0x12   : > { %v2942_v5 = vld [vmem:[%s2929_s30 + $0x20] sm:$0xff]  ;;  %v334_v6 = vpack.c.bf16 %v2939_v4, %v326_v3  ;;  %v2946_v7 = vld [vmem:[%s2929_s30 + $0x30] sm:$0xff] }
  0x13   : > { %v2949_v8 = vld [vmem:[%s2929_s30 + $0x40] sm:$0xff]  ;;  %v2952_v9 = vld [vmem:[%s2929_s30 + $0x50] sm:$0xff]  ;;  %v1022_v10 = vpack.c.bf16 %v2942_v5, %v2939_v4  ;;  %v335_v11 = vpack.c.bf16 %v2946_v7, %v2942_v5  ;;  %v2867_v4 = vmov 0.0  }
  0x14   : > { %v336_v13 = vpack.c.bf16 %v2952_v9, %v2949_v8  ;;  %v2962_v14 = vld [vmem:[%s2929_s30 + $0x60] sm:$0xff]  ;;  %v1023_v16 = vpack.c.bf16 %v2949_v8, %v2946_v7  ;;  %2525 = vmatprep.mubr.msk.bf16.mxu0 %vm340_vm1, %v334_v6  ;;  %v2971_v17 = vld [vmem:[%s2935_s9 + $0x10] sm:$0xff]  ;;  %1250 = vst.msk [vmem:[#allocation2 + $0x30] sm:$0xff] %vm1242_vm2, %v2867_v4  ;;  %1243 = vst.msk [vmem:[#allocation2] sm:$0xff] %vm1242_vm2, %v2867_v4 }
  0x15   : > { %v2974_v18 = vld [vmem:[%s2935_s9 + $0x20] sm:$0xff]  ;;  %v2977_v19 = vld [vmem:[%s2935_s9 + $0x30] sm:$0xff]  ;;  %v1024_v20 = vpack.c.bf16 %v2962_v14, %v2952_v9  ;;  %2526 = vmatmul.mubr.msk.bf16.vlgmr.msra.gmra.mrb[0].mxu0 %vm340_vm1, %v335_v11  ;;  %v733_v11 = vsel %vm353_vm0, %v2337_v58, 0  ;;  %1251 = vst.msk [vmem:[#allocation2 + $0x38] sm:$0x3] %vm1244_vm3, %v2867_v4 }
  0x16   : > { %v2983_v21 = vld [vmem:[%s2935_s9 + $0x40] sm:$0xff]  ;;  %v2986_v22 = vld [vmem:[%s2935_s9 + $0x50] sm:$0xff]  ;;  %v919_v24 = vpack.c.bf16 %v2974_v18, %v2971_v17  ;;  %2534 = vmatpush3.bf16.msra.mxu0 %v435_v12  ;;  %2529 = vmatprep.mubr.msk.bf16.mxu0 %vm340_vm1, %v336_v13  ;;  %v322_v42 = vpack.c.bf16 %v2977_v19, %v2974_v18  ;;  %v2342_v12 = vld [vmem:[%s3421_s4 + $0xa] sm:$0x3]  ;;  %1245 = vst.msk [vmem:[#allocation2 + $0x8] sm:$0x3] %vm1244_vm3, %v2867_v4 }
  0x17   : > { %v2989_v23 = vld [vmem:[%s2935_s9 + $0x60] sm:$0xff]  ;;  %v2995_v25 = vld [vmem:[%s2929_s30 + $0x70] sm:$0xff]  ;;  %v920_v28 = vpack.c.bf16 %v2983_v21, %v2977_v19  ;;  %2833 = vmatprep.subr.msk.bf16.mxu0 %vm353_vm0, %v2327_v15  ;;  %v323_v46 = vpack.c.bf16 %v2986_v22, %v2983_v21  ;;  %1246 = vst.msk [vmem:[#allocation2 + $0x10] sm:$0xff] %vm1242_vm2, %v2867_v4  ;;  %1248 = vst.msk [vmem:[#allocation2 + $0x20] sm:$0xff] %vm1242_vm2, %v2867_v4 }
  0x18   : > { %v313_v26 = vld [vmem:[%s2935_s9] sm:$0xff]  ;;  %v2999_v27 = vld [vmem:[%s2935_s9 + $0x11] sm:$0xff]  ;;  %v921_v29 = vpack.c.bf16 %v2989_v23, %v2986_v22  ;;  %v337_v37 = vpack.c.bf16 %v2995_v25, %v2962_v14  ;;  %1247 = vst.msk [vmem:[#allocation2 + $0x18] sm:$0x3] %vm1244_vm3, %v2867_v4  ;;  %1249 = vst.msk [vmem:[#allocation2 + $0x28] sm:$0x3] %vm1244_vm3, %v2867_v4 }
  0x19   : > { %v3007_v30 = vld [vmem:[%s2935_s9 + $0x21] sm:$0xff]  ;;  %v3010_v31 = vld [vmem:[%s2935_s9 + $0x31] sm:$0xff]  ;;  %v321_v39 = vpack.c.bf16 %v2971_v17, %v313_v26  ;;  %1252 = vst.msk [vmem:[#allocation2 + $0x40] sm:$0xff] %vm1242_vm2, %v2867_v4  ;;  %1254 = vst.msk [vmem:[#allocation2 + $0x50] sm:$0xff] %vm1242_vm2, %v2867_v4 }
  0x1a   : > { %v3013_v32 = vld [vmem:[%s2935_s9 + $0x41] sm:$0xff]  ;;  %v3016_v33 = vld [vmem:[%s2935_s9 + $0x51] sm:$0xff]  ;;  %v1124_v35 = vpack.c.bf16 %v3007_v30, %v2999_v27  ;;  %v511_v55 = vpack.c.bf16 %v3010_v31, %v3007_v30  ;;  %1253 = vst.msk [vmem:[#allocation2 + $0x48] sm:$0x3] %vm1244_vm3, %v2867_v4  ;;  %1255 = vst.msk [vmem:[#allocation2 + $0x58] sm:$0x3] %vm1244_vm3, %v2867_v4 }
  0x1b   : > { %v3019_v34 = vld [vmem:[%s2935_s9 + $0x61] sm:$0xff]  ;;  %v1125_v36 = vpack.c.bf16 %v3013_v32, %v3010_v31  ;;  %v3033_v40 = vld [vmem:[%s2935_s9 + $0x70] sm:$0xff]  ;;  %v512_v56 = vpack.c.bf16 %v3016_v33, %v3013_v32  ;;  %1256 = vst.msk [vmem:[#allocation2 + $0x60] sm:$0xff] %vm1242_vm2, %v2867_v4  ;;  %1258 = vst.msk [vmem:[#allocation2 + $0x70] sm:$0xff] %vm1242_vm2, %v2867_v4 }
  0x1c   : > { %v1126_v38 = vpack.c.bf16 %v3019_v34, %v3016_v33  ;;  %v3036_v41 = vld [vmem:[%s2935_s9 + $0x71] sm:$0xff]  ;;  %v3041_v43 = vld [vmem:[%s2935_s9 + $0x80] sm:$0xff]  ;;  %v324_v53 = vpack.c.bf16 %v3033_v40, %v2989_v23  ;;  %1257 = vst.msk [vmem:[#allocation2 + $0x68] sm:$0x3] %vm1244_vm3, %v2867_v4  ;;  %1259 = vst.msk [vmem:[#allocation2 + $0x78] sm:$0x3] %vm1244_vm3, %v2867_v4 }
  0x1d   : > { %2530 = vmatmul.mubr.msk.bf16.gmra.mrb[4].mxu0 %vm340_vm1, %v337_v37  ;;  %v3044_v44 = vld [vmem:[%s2929_s30 + $0x80] sm:$0xff]  ;;  %v922_v47 = vpack.c.bf16 %v3041_v43, %v3033_v40  ;;  %v605_v60 = vld [vmem:[%s3079_s16 + $0x10] sm:$0xff]  ;;  %v513_v61 = vpack.c.bf16 %v3036_v41, %v3019_v34  ;;  %1260 = vst.msk [vmem:[#allocation2 + $0x80] sm:$0xff] %vm1242_vm2, %v2867_v4  ;;  %1262 = vst.msk [vmem:[#allocation2 + $0x90] sm:$0xff] %vm1242_vm2, %v2867_v4 }
  0x1e   : > { %2535 = vmatprep.mubr.msk.bf16.mxu0 %vm340_vm1, %v321_v39  ;;  %v3047_v45 = vld [vmem:[%s2935_s9 + $0x81] sm:$0xff]  ;;  %v1025_v48 = vpack.c.bf16 %v3044_v44, %v2995_v25  ;;  %v607_v0 = vld [vmem:[%s3079_s16 + $0x30] sm:$0xff]  ;;  %1261 = vst.msk [vmem:[#allocation2 + $0x88] sm:$0x3] %vm1244_vm3, %v2867_v4  ;;  %1263 = vst.msk [vmem:[#allocation2 + $0x98] sm:$0x3] %vm1244_vm3, %v2867_v4 }
  0x1f   : > { %v1127_v49 = vpack.c.bf16 %v3047_v45, %v3036_v41  ;;  %v502_v52 = vld [vmem:[%s2935_s9 + $0x1] sm:$0xff]  ;;  %v609_v2 = vld [vmem:[%s3079_s16 + $0x50] sm:$0xff] }
  0x20   : > { %v510_v54 = vpack.c.bf16 %v2999_v27, %v502_v52  ;;  %v604_v59 = vld [vmem:[%s3079_s16] sm:$0xff]  ;;  %v611_v15 = vld [vmem:[%s3079_s16 + $0x70] sm:$0xff] }
  0x21   : > { %v612_v62 = vpack.c.bf16 %v605_v60, %v604_v59  ;;  %v606_v63 = vld [vmem:[%s3079_s16 + $0x20] sm:$0xff]  ;;  %v707_v37 = vld [vmem:[%s306_s23 + $0x10] sm:$0xff] }
  0x22   : > { %v608_v1 = vld [vmem:[%s3079_s16 + $0x40] sm:$0xff]  ;;  %v613_v3 = vpack.c.bf16 %v607_v0, %v606_v63  ;;  %v711_v52 = vld [vmem:[%s306_s23 + $0x50] sm:$0xff] }
  0x23   : > { %v614_v6 = vpack.c.bf16 %v609_v2, %v608_v1  ;;  %v610_v13 = vld [vmem:[%s3079_s16 + $0x60] sm:$0xff]  ;;  %v809_v60 = vld [vmem:[%s3079_s16 + $0x11] sm:$0xff] }
  0x24   : > { %v706_v26 = vld [vmem:[%s306_s23] sm:$0xff]  ;;  %v615_v39 = vpack.c.bf16 %v611_v15, %v610_v13  ;;  %v811_v0 = vld [vmem:[%s3079_s16 + $0x31] sm:$0xff] }
  0x25   : > { %2536 = vmatmul.mubr.msk.bf16.vlgmr.msra.gmra.mrb[0].mxu0 %vm340_vm1, %v322_v42  ;;  %v714_v42 = vpack.c.bf16 %v707_v37, %v706_v26  ;;  %v808_v59 = vld [vmem:[%s3079_s16 + $0x1] sm:$0xff]  ;;  %v813_v2 = vld [vmem:[%s3079_s16 + $0x51] sm:$0xff] }
  0x26   : > { %2544 = vmatpush3.bf16.msra.mxu0 %v529_v50  ;;  %2539 = vmatprep.mubr.msk.bf16.mxu0 %vm340_vm1, %v323_v46  ;;  %v708_v46 = vld [vmem:[%s306_s23 + $0x20] sm:$0xff]  ;;  %v709_v50 = vld [vmem:[%s306_s23 + $0x30] sm:$0xff] }
  0x27   : > { %2834 = vmatprep.subr.msk.bf16.mxu0 %vm353_vm0, %v2332_v51  ;;  %v710_v51 = vld [vmem:[%s306_s23 + $0x40] sm:$0xff]  ;;  %v815_v15 = vld [vmem:[%s3079_s16 + $0x71] sm:$0xff] }
  0x28   : > { %v810_v63 = vld [vmem:[%s3079_s16 + $0x21] sm:$0xff] }
  0x29   : > { %v812_v1 = vld [vmem:[%s3079_s16 + $0x41] sm:$0xff] }
  0x2a   : > { %v814_v13 = vld [vmem:[%s3079_s16 + $0x61] sm:$0xff] }
  0x2b   : > { %v819_v26 = vpack.c.bf16 %v815_v15, %v814_v13  ;;  %v2386_v5 = vld [vmem:[%s3422_s5 + $0x4] sm:$0xf]  ;;  %v1285_v8 = vld [vmem:[%s3422_s5] sm:$0xf] }
  0x2c   : > { %2840 = vmatprep.subr.msk.bf16.mxu1 %vm1312_vm4, %v2386_v5  ;;  %v1314_v7 = vsel %vm1312_vm4, %v2386_v5, 0  ;;  %v1286_v32 = vld [vmem:[#allocation2 + $0x1] sm:$0xff] }
  0x2d   : > { %2540 = vmatmul.mubr.msk.bf16.gmra.mrb[4].mxu0 %vm340_vm1, %v324_v53  ;;  %v715_v53 = vpack.c.bf16 %v709_v50, %v708_v46  ;;  %2614 = vmatpush3.bf16.msra.mxu1 %v1314_v7  ;;  %v2405_v7 = vld [vmem:[%s3422_s5 + $0x10] sm:$0xf] }
  0x2e   : > { %2545 = vmatprep.mubr.msk.bf16.mxu0 %vm340_vm1, %v510_v54  ;;  %v716_v54 = vpack.c.bf16 %v711_v52, %v710_v51  ;;  %2841 = vmatprep.subr.msk.bf16.mxu1 %vm1312_vm4, %v1285_v8  ;;  %v1273_v52 = vld [vmem:[#allocation2] sm:$0xff] }
  0x35   : > { %2546 = vmatmul.mubr.msk.bf16.vlgmr.msra.gmra.mrb[0].mxu0 %vm340_vm1, %v511_v55  ;;  %v835_v55 = vsel %vm353_vm0, %v2342_v12, 0 }
  0x36   : > { %2554 = vmatpush3.bf16.msra.mxu0 %v631_v57  ;;  %2549 = vmatprep.mubr.msk.bf16.mxu0 %vm340_vm1, %v512_v56  ;;  %v2355_v56 = vld [vmem:[%s3421_s4 + $0xc] sm:$0x3]  ;;  %v712_v57 = vld [vmem:[%s306_s23 + $0x60] sm:$0xff] }
  0x37   : > { %2835 = vmatprep.subr.msk.bf16.mxu0 %vm353_vm0, %v2337_v58  ;;  %v713_v58 = vld [vmem:[%s306_s23 + $0x70] sm:$0xff] }
  0x3d   : > { %2550 = vmatmul.mubr.msk.bf16.gmra.mrb[4].mxu0 %vm340_vm1, %v513_v61  ;;  %v717_v61 = vpack.c.bf16 %v713_v58, %v712_v57 }
  0x3e   : > { %2555 = vmatprep.mubr.msk.bf16.mxu0 %vm340_vm1, %v612_v62  ;;  %v816_v62 = vpack.c.bf16 %v809_v60, %v808_v59 }
  0x45   : > { %2556 = vmatmul.mubr.msk.bf16.vlgmr.msra.gmra.mrb[0].mxu0 %vm340_vm1, %v613_v3  ;;  %v817_v3 = vpack.c.bf16 %v811_v0, %v810_v63 }
  0x46   : > { %2564 = vmatpush3.bf16.msra.mxu0 %v733_v11  ;;  %2559 = vmatprep.mubr.msk.bf16.mxu0 %vm340_vm1, %v614_v6  ;;  %v818_v6 = vpack.c.bf16 %v813_v2, %v812_v1  ;;  %v938_v11 = vsel %vm353_vm0, %v2355_v56, 0  ;;  %v2400_v1 = vld [vmem:[%s3422_s5 + $0xc] sm:$0xf] }
  0x47   : > { %2836 = vmatprep.subr.msk.bf16.mxu0 %vm353_vm0, %v2342_v12  ;;  %v2368_v12 = vld [vmem:[%s3421_s4 + $0xe] sm:$0x3] }
  0x48   : > { %v1041_v37 = vsel %vm353_vm0, %v2368_v12, 0 }
  0x4d   : > { %2560 = vmatmul.mubr.msk.bf16.gmra.mrb[4].mxu0 %vm340_vm1, %v615_v39  ;;  %v2381_v39 = vld [vmem:[%s3421_s4 + $0x10] sm:$0x3] }
  0x4e   : > { %2565 = vmatprep.mubr.msk.bf16.mxu0 %vm340_vm1, %v714_v42  ;;  %v1143_v17 = vsel %vm353_vm0, %v2381_v39, 0  ;;  %v2395_v42 = vld [vmem:[%s3422_s5 + $0x8] sm:$0xf] }
  0x55   : > { %2566 = vmatmul.mubr.msk.bf16.vlgmr.msra.gmra.mrb[0].mxu0 %vm340_vm1, %v715_v53 }
  0x56   : > { %2574 = vmatpush3.bf16.msra.mxu0 %v835_v55  ;;  %2569 = vmatprep.mubr.msk.bf16.mxu0 %vm340_vm1, %v716_v54 }
  0x57   : > { %2837 = vmatprep.subr.msk.bf16.mxu0 %vm353_vm0, %v2355_v56 }
  0x5d   : > { %2570 = vmatmul.mubr.msk.bf16.gmra.mrb[4].mxu0 %vm340_vm1, %v717_v61 }
  0x5e   : > { %2575 = vmatprep.mubr.msk.bf16.mxu0 %vm340_vm1, %v816_v62  ;;  %v1488_v62 = vsel %vm1312_vm4, %v2395_v42, 0 }
  0x65   : > { %2576 = vmatmul.mubr.msk.bf16.vlgmr.msra.gmra.mrb[0].mxu0 %vm340_vm1, %v817_v3  ;;  %v1461_v3 = vld [vmem:[#allocation2 + $0x2] sm:$0xff] }
  0x66   : > { %2584 = vmatpush3.bf16.msra.mxu0 %v938_v11  ;;  %2579 = vmatprep.mubr.msk.bf16.mxu0 %vm340_vm1, %v818_v6 }
  0x67   : > { %2838 = vmatprep.subr.msk.bf16.mxu0 %vm353_vm0, %v2368_v12 }
  0x6d   : > { %2580 = vmatmul.mubr.msk.bf16.gmra.mrb[4].mxu0 %vm340_vm1, %v819_v26 }
  0x6e   : > { %2585 = vmatprep.mubr.msk.bf16.mxu0 %vm340_vm1, %v919_v24 }
  0x75   : > { %2586 = vmatmul.mubr.msk.bf16.vlgmr.msra.gmra.mrb[0].mxu0 %vm340_vm1, %v920_v28 }
  0x76   : > { %2594 = vmatpush3.bf16.msra.mxu0 %v1041_v37  ;;  %2589 = vmatprep.mubr.msk.bf16.mxu0 %vm340_vm1, %v921_v29 }
  0x77   : > { %2839 = vmatprep.subr.msk.bf16.mxu0 %vm353_vm0, %v2381_v39 }
  0x7d   : > { %2590 = vmatmul.mubr.msk.bf16.gmra.mrb[4].mxu0 %vm340_vm1, %v922_v47 }
  0x7e   : > { %2595 = vmatprep.mubr.msk.bf16.mxu0 %vm340_vm1, %v1022_v10 }
  0x85   : > { %2596 = vmatmul.mubr.msk.bf16.vlgmr.msra.gmra.mrb[0].mxu0 %vm340_vm1, %v1023_v16 }
  0x86   : > { %2604 = vmatpush3.bf16.msra.mxu0 %v1143_v17  ;;  %2599 = vmatprep.mubr.msk.bf16.mxu0 %vm340_vm1, %v1024_v20  ;;  %v1590_v17 = vsel %vm1312_vm4, %v2400_v1, 0 }
  0x8d   : > { %2600 = vmatmul.mubr.msk.bf16.gmra.mrb[4].mxu0 %vm340_vm1, %v1025_v48 }
  0x8e   : > { %2605 = vmatprep.mubr.msk.bf16.mxu0 %vm340_vm1, %v1124_v35 }
  0x95   : > { %2606 = vmatmul.mubr.msk.bf16.vlgmr.msra.gmra.mrb[0].mxu0 %vm340_vm1, %v1125_v36 }
  0x96   : > { %2609 = vmatprep.mubr.msk.bf16.mxu0 %vm340_vm1, %v1126_v38 }
  0x9d   : > { %2610 = vmatmul.mubr.msk.bf16.gmra.mrb[4].mxu0 %vm340_vm1, %v1127_v49  ;;  %v1394_v49 = vsel %vm1312_vm4, %v1285_v8, 0 }
 0x168   : > { %v2607_v9 = vpop.f32.mrb[0].mxu0 }
 0x169   : > { %vm1220_vm5 = vcmp.ge.f32.partialorder %v2607_v9, 0.0  ;;  %v1228_v10 = vmul.f32 0.01, %v2607_v9  ;;  %v1179_v14 = vpop.f32.mrb[1].mxu0 }
 0x16a   : > { %vm1218_vm6 = vcmp.ge.f32.partialorder %v1179_v14, 0.0  ;;  %v1226_v16 = vmul.f32 0.01, %v1179_v14  ;;  %v2608_v18 = vpop.f32.mrb[2].mxu0 }
 0x16b   : > { %v3220_v19 = vsel %vm1220_vm5, %v2607_v9, %v1228_v10  ;;  %vm1221_vm7 = vcmp.ge.f32.partialorder %v2608_v18, 0.0  ;;  %v1229_v20 = vmul.f32 0.01, %v2608_v18  ;;  %v1182_v21 = vpop.f32.mrb[3].mxu0 }
 0x16c   : > { %1267 = vst.msk [vmem:[#allocation2 + $0x31] sm:$0xff] %vm1242_vm2, %v3220_v19  ;;  %v3224_v22 = vsel %vm1218_vm6, %v1179_v14, %v1226_v16  ;;  %vm1219_vm8 = vcmp.ge.f32.partialorder %v1182_v21, 0.0  ;;  %v1227_v23 = vmul.f32 0.01, %v1182_v21 }
 0x16d   : > { %1265 = vst.msk [vmem:[#allocation2 + $0x11] sm:$0xff] %vm1242_vm2, %v3224_v22  ;;  %v3228_v24 = vsel %vm1221_vm7, %v2608_v18, %v1229_v20  ;;  %v1692_v18 = vsel %vm1312_vm4, %v2405_v7, 0 }
 0x16e   : > { %1268 = vst.msk [vmem:[#allocation2 + $0x41] sm:$0xff] %vm1242_vm2, %v3228_v24  ;;  %v3232_v25 = vsel %vm1219_vm8, %v1182_v21, %v1227_v23  ;;  %v2410_v21 = vld [vmem:[%s3422_s5 + $0x14] sm:$0xf] }
 0x16f   : > { %1266 = vst.msk [vmem:[#allocation2 + $0x21] sm:$0xff] %vm1242_vm2, %v3232_v25 }
 0x170   : > { %v2611_v27 = vpop.f32.mrb[4].mxu0 }
 0x171   : > { %vm1224_vm9 = vcmp.ge.f32.partialorder %v2611_v27, 0.0  ;;  %v1232_v28 = vmul.f32 0.01, %v2611_v27  ;;  %v1195_v29 = vpop.f32.mrb[5].mxu0 }
 0x172   : > { %vm1222_vm10 = vcmp.ge.f32.partialorder %v1195_v29, 0.0  ;;  %v1230_v30 = vmul.f32 0.01, %v1195_v29  ;;  %v2612_v31 = vpop.f32.mrb[6].mxu0 }
 0x173   : > { %v3236_v33 = vsel %vm1224_vm9, %v2611_v27, %v1232_v28  ;;  %vm1225_vm11 = vcmp.ge.f32.partialorder %v2612_v31, 0.0  ;;  %v1233_v34 = vmul.f32 0.01, %v2612_v31  ;;  %v1198_v35 = vpop.f32.mrb[7].mxu0  ;;  %v3255_v47 = vld [vmem:[#allocation2 + $0x31] sm:$0xff] }
 0x174   : > { %1271 = vst.msk [vmem:[#allocation2 + $0x71] sm:$0xff] %vm1242_vm2, %v3236_v33  ;;  %v3240_v36 = vsel %vm1222_vm10, %v1195_v29, %v1230_v30  ;;  %vm1223_vm12 = vcmp.ge.f32.partialorder %v1198_v35, 0.0  ;;  %v1231_v38 = vmul.f32 0.01, %v1198_v35  ;;  %v3242_v40 = vld [vmem:[#allocation2 + $0x11] sm:$0xff]  ;;  %v1794_v30 = vsel %vm1312_vm4, %v2410_v21, 0 }
 0x175   : > { %1269 = vst.msk [vmem:[#allocation2 + $0x51] sm:$0xff] %vm1242_vm2, %v3240_v36  ;;  %v3246_v41 = vsel %vm1225_vm11, %v2612_v31, %v1233_v34  ;;  %v1294_v43 = vpack.c.bf16 %v3242_v40, %v1286_v32  ;;  %v3271_v46 = vld [vmem:[#allocation2 + $0x41] sm:$0xff]  ;;  %v1274_v53 = vld [vmem:[#allocation2 + $0x10] sm:$0xff]  ;;  %v2415_v32 = vld [vmem:[%s3422_s5 + $0x18] sm:$0xf] }
 0x176   : > { %1272 = vst.msk [vmem:[#allocation2 + $0x81] sm:$0xff] %vm1242_vm2, %v3246_v41  ;;  %v3251_v44 = vsel %vm1223_vm12, %v1198_v35, %v1231_v38  ;;  %v3253_v45 = vld [vmem:[#allocation2 + $0x21] sm:$0xff]  ;;  %v1281_v57 = vpack.c.bf16 %v1274_v53, %v1273_v52  ;;  %v1276_v60 = vld [vmem:[#allocation2 + $0x30] sm:$0xff]  ;;  %v1674_v29 = vpack.c.bf16 %v3271_v46, %v3255_v47 }
 0x177   : > { %1270 = vst.msk [vmem:[#allocation2 + $0x61] sm:$0xff] %vm1242_vm2, %v3251_v44  ;;  %2615 = vmatprep.mubr.msk.bf16.mxu1 %vm1242_vm2, %v1294_v43  ;;  %v3262_v48 = vpack.c.bf16 %v3255_v47, %v3253_v45  ;;  %v1275_v58 = vld [vmem:[#allocation2 + $0x20] sm:$0xff]  ;;  %v1462_v6 = vld [vmem:[#allocation2 + $0x12] sm:$0xff]  ;;  %v1673_v28 = vpack.c.bf16 %v3253_v45, %v3242_v40  ;;  %v1897_v43 = vsel %vm1312_vm4, %v2415_v32, 0  ;;  %v2420_v47 = vld [vmem:[%s3422_s5 + $0x1c] sm:$0xf] }
 0x178   : > { %v3292_v61 = vpack.c.bf16 %v1276_v60, %v1275_v58  ;;  %v1277_v63 = vld [vmem:[#allocation2 + $0x40] sm:$0xff]  ;;  %v1469_v13 = vpack.c.bf16 %v1462_v6, %v1461_v3  ;;  %v1464_v37 = vld [vmem:[#allocation2 + $0x32] sm:$0xff]  ;;  %v1571_v14 = vpack.c.bf16 %v1275_v58, %v1274_v53 }
 0x179   : > { %2616 = vmatmul.mubr.msk.bf16.vlgmr.msra.gmra.mrb[0].mxu1 %vm1242_vm2, %v3262_v48  ;;  %v1463_v15 = vld [vmem:[#allocation2 + $0x22] sm:$0xff]  ;;  %v1572_v16 = vpack.c.bf16 %v1277_v63, %v1276_v60  ;;  %v1877_v52 = vld [vmem:[#allocation2 + $0x90] sm:$0xff] }
 0x17a   : > { %2624 = vmatpush3.bf16.msra.mxu1 %v1394_v49  ;;  %v3310_v39 = vpack.c.bf16 %v1464_v37, %v1463_v15  ;;  %v1465_v4 = vld [vmem:[#allocation2 + $0x42] sm:$0xff]  ;;  %v1775_v38 = vpack.c.bf16 %v1463_v15, %v1462_v6 }
 0x17b   : > { %2842 = vmatprep.subr.msk.bf16.mxu1 %vm1312_vm4, %v2395_v42  ;;  %v3281_v55 = vld [vmem:[#allocation2 + $0x71] sm:$0xff]  ;;  %v1776_v40 = vpack.c.bf16 %v1465_v4, %v1464_v37 }
 0x17c   : > { %v3273_v50 = vld [vmem:[#allocation2 + $0x51] sm:$0xff] }
 0x17d   : > { %v3277_v51 = vpack.c.bf16 %v3273_v50, %v3271_v46  ;;  %v1278_v59 = vld [vmem:[#allocation2 + $0x50] sm:$0xff]  ;;  %v1570_v23 = vld [vmem:[#allocation2 + $0x80] sm:$0xff]  ;;  %v1999_v46 = vsel %vm1312_vm4, %v2420_v47, 0 }
 0x17e   : > { %v3279_v54 = vld [vmem:[#allocation2 + $0x61] sm:$0xff]  ;;  %v3295_v0 = vpack.c.bf16 %v1278_v59, %v1277_v63  ;;  %v1280_v11 = vld [vmem:[#allocation2 + $0x70] sm:$0xff]  ;;  %v1881_v53 = vpack.c.bf16 %v1877_v52, %v1570_v23 }
 0x17f   : > { %2619 = vmatprep.mubr.msk.bf16.mxu1 %vm1242_vm2, %v3277_v51  ;;  %v3287_v56 = vpack.c.bf16 %v3281_v55, %v3279_v54  ;;  %v1279_v2 = vld [vmem:[#allocation2 + $0x60] sm:$0xff]  ;;  %v1466_v26 = vld [vmem:[#allocation2 + $0x52] sm:$0xff]  ;;  %v1574_v27 = vpack.c.bf16 %v1570_v23, %v1280_v11  ;;  %v1675_v31 = vpack.c.bf16 %v3279_v54, %v3273_v50 }
 0x180   : > { %v3305_v12 = vpack.c.bf16 %v1280_v11, %v1279_v2  ;;  %v3313_v5 = vpack.c.bf16 %v1466_v26, %v1465_v4  ;;  %v1467_v8 = vld [vmem:[#allocation2 + $0x62] sm:$0xff]  ;;  %v1468_v9 = vld [vmem:[#allocation2 + $0x72] sm:$0xff]  ;;  %v1573_v20 = vpack.c.bf16 %v1279_v2, %v1278_v59 }
 0x181   : > { %2620 = vmatmul.mubr.msk.bf16.gmra.mrb[4].mxu1 %vm1242_vm2, %v3287_v56  ;;  %v1472_v10 = vpack.c.bf16 %v1468_v9, %v1467_v8  ;;  %v1672_v34 = vld [vmem:[#allocation2 + $0x81] sm:$0xff]  ;;  %v1777_v45 = vpack.c.bf16 %v1467_v8, %v1466_v26 }
 0x182   : > { %2625 = vmatprep.mubr.msk.bf16.mxu1 %vm1242_vm2, %v1281_v57  ;;  %v1676_v35 = vpack.c.bf16 %v1672_v34, %v3281_v55  ;;  %v1774_v49 = vld [vmem:[#allocation2 + $0x82] sm:$0xff]  ;;  %v1979_v55 = vld [vmem:[#allocation2 + $0x91] sm:$0xff] }
 0x183   : > { %v1778_v42 = vpack.c.bf16 %v1774_v49, %v1468_v9  ;;  %v2425_v50 = vld [vmem:[%s3422_s5 + $0x20] sm:$0xf]  ;;  %v1983_v57 = vpack.c.bf16 %v1979_v55, %v1672_v34 }
 0x184   : > { %v2101_v54 = vsel %vm1312_vm4, %v2425_v50, 0 }
 0x189   : > { %2626 = vmatmul.mubr.msk.bf16.vlgmr.msra.gmra.mrb[0].mxu1 %vm1242_vm2, %v3292_v61 }
 0x18a   : > { %2634 = vmatpush3.bf16.msra.mxu1 %v1488_v62  ;;  %2629 = vmatprep.mubr.msk.bf16.mxu1 %vm1242_vm2, %v3295_v0 }
 0x18b   : > { %2843 = vmatprep.subr.msk.bf16.mxu1 %vm1312_vm4, %v2400_v1 }
 0x191   : > { %2630 = vmatmul.mubr.msk.bf16.gmra.mrb[4].mxu1 %vm1242_vm2, %v3305_v12 }
 0x192   : > { %2635 = vmatprep.mubr.msk.bf16.mxu1 %vm1242_vm2, %v1469_v13 }
 0x199   : > { %2636 = vmatmul.mubr.msk.bf16.vlgmr.msra.gmra.mrb[0].mxu1 %vm1242_vm2, %v3310_v39 }
 0x19a   : > { %2644 = vmatpush3.bf16.msra.mxu1 %v1590_v17  ;;  %2639 = vmatprep.mubr.msk.bf16.mxu1 %vm1242_vm2, %v3313_v5 }
 0x19b   : > { %2844 = vmatprep.subr.msk.bf16.mxu1 %vm1312_vm4, %v2405_v7 }
 0x1a1   : > { %2640 = vmatmul.mubr.msk.bf16.gmra.mrb[4].mxu1 %vm1242_vm2, %v1472_v10 }
 0x1a2   : > { %2645 = vmatprep.mubr.msk.bf16.mxu1 %vm1242_vm2, %v1571_v14 }
 0x1a9   : > { %2646 = vmatmul.mubr.msk.bf16.vlgmr.msra.gmra.mrb[0].mxu1 %vm1242_vm2, %v1572_v16 }
 0x1aa   : > { %2654 = vmatpush3.bf16.msra.mxu1 %v1692_v18  ;;  %2649 = vmatprep.mubr.msk.bf16.mxu1 %vm1242_vm2, %v1573_v20 }
 0x1ab   : > { %2845 = vmatprep.subr.msk.bf16.mxu1 %vm1312_vm4, %v2410_v21 }
 0x1b1   : > { %2650 = vmatmul.mubr.msk.bf16.gmra.mrb[4].mxu1 %vm1242_vm2, %v1574_v27 }
 0x1b2   : > { %2655 = vmatprep.mubr.msk.bf16.mxu1 %vm1242_vm2, %v1673_v28 }
 0x1b9   : > { %2656 = vmatmul.mubr.msk.bf16.vlgmr.msra.gmra.mrb[0].mxu1 %vm1242_vm2, %v1674_v29 }
 0x1ba   : > { %2664 = vmatpush3.bf16.msra.mxu1 %v1794_v30  ;;  %2659 = vmatprep.mubr.msk.bf16.mxu1 %vm1242_vm2, %v1675_v31 }
 0x1bb   : > { %2846 = vmatprep.subr.msk.bf16.mxu1 %vm1312_vm4, %v2415_v32 }
 0x1c1   : > { %2660 = vmatmul.mubr.msk.bf16.gmra.mrb[4].mxu1 %vm1242_vm2, %v1676_v35 }
 0x1c2   : > { %2665 = vmatprep.mubr.msk.bf16.mxu1 %vm1242_vm2, %v1775_v38 }
 0x1c9   : > { %2666 = vmatmul.mubr.msk.bf16.vlgmr.msra.gmra.mrb[0].mxu1 %vm1242_vm2, %v1776_v40 }
 0x1ca   : > { %2674 = vmatpush3.bf16.msra.mxu1 %v1897_v43  ;;  %2669 = vmatprep.mubr.msk.bf16.mxu1 %vm1242_vm2, %v1777_v45 }
 0x1cb   : > { %2847 = vmatprep.subr.msk.bf16.mxu1 %vm1312_vm4, %v2420_v47 }
 0x1d1   : > { %2670 = vmatmul.mubr.msk.bf16.gmra.mrb[4].mxu1 %vm1242_vm2, %v1778_v42 }
 0x1d2   : > { %2675 = vmatprep.mubr.msk.bf16.mxu1 %vm1242_vm2, %v3292_v61 }
 0x1d9   : > { %2676 = vmatmul.mubr.msk.bf16.vlgmr.msra.gmra.mrb[0].mxu1 %vm1242_vm2, %v3295_v0 }
 0x1da   : > { %2684 = vmatpush3.bf16.msra.mxu1 %v1999_v46  ;;  %2679 = vmatprep.mubr.msk.bf16.mxu1 %vm1242_vm2, %v3305_v12 }
 0x1db   : > { %2848 = vmatprep.subr.msk.bf16.mxu1 %vm1312_vm4, %v2425_v50 }
 0x1e1   : > { %2680 = vmatmul.mubr.msk.bf16.gmra.mrb[4].mxu1 %vm1242_vm2, %v1881_v53 }
 0x1e2   : > { %2685 = vmatprep.mubr.msk.bf16.mxu1 %vm1242_vm2, %v3262_v48  ;;  %v2081_v48 = vld [vmem:[#allocation2 + $0x92] sm:$0xff] }
 0x1e3   : > { %v2085_v58 = vpack.c.bf16 %v2081_v48, %v1774_v49 }
 0x1e9   : > { %2686 = vmatmul.mubr.msk.bf16.vlgmr.msra.gmra.mrb[0].mxu1 %vm1242_vm2, %v3277_v51 }
 0x1ea   : > { %2694 = vmatpush3.bf16.msra.mxu1 %v2101_v54  ;;  %2689 = vmatprep.mubr.msk.bf16.mxu1 %vm1242_vm2, %v3287_v56 }
 0x1f1   : > { %2690 = vmatmul.mubr.msk.bf16.gmra.mrb[4].mxu1 %vm1242_vm2, %v1983_v57 }
 0x1f2   : > { %2695 = vmatprep.mubr.msk.bf16.mxu1 %vm1242_vm2, %v3310_v39 }
 0x1f9   : > { %2696 = vmatmul.mubr.msk.bf16.vlgmr.msra.gmra.mrb[0].mxu1 %vm1242_vm2, %v3313_v5 }
 0x1fa   : > { %2699 = vmatprep.mubr.msk.bf16.mxu1 %vm1242_vm2, %v1472_v10 }
 0x201   : > { %2700 = vmatmul.mubr.msk.bf16.gmra.mrb[4].mxu1 %vm1242_vm2, %v2085_v58 }
 0x2cc   : > { %v2697_v51 = vpop.f32.mrb[0].mxu1 }
 0x2cd   : > { %vm2178_vm13 = vcmp.ge.f32.partialorder %v2697_v51, 0.0  ;;  %v2186_v56 = vmul.f32 0.01, %v2697_v51  ;;  %v2137_v59 = vpop.f32.mrb[1].mxu1 }
 0x2ce   : > { %vm2176_vm14 = vcmp.ge.f32.partialorder %v2137_v59, 0.0  ;;  %v2184_v60 = vmul.f32 0.01, %v2137_v59  ;;  %v2698_v61 = vpop.f32.mrb[2].mxu1 }
 0x2cf   : > { %v2194_v62 = vsel %vm2178_vm13, %v2697_v51, %v2186_v56  ;;  %vm2179_vm15 = vcmp.ge.f32.partialorder %v2698_v61, 0.0  ;;  %v2187_v63 = vmul.f32 0.01, %v2698_v61  ;;  %v2140_v0 = vpop.f32.mrb[3].mxu1 }
 0x2d0   : > { %v2202_v1 = vadd.f32 %v2194_v62, %v3220_v19  ;;  %v2192_v2 = vsel %vm2176_vm14, %v2137_v59, %v2184_v60  ;;  %vm2177_vm0 = vcmp.ge.f32.partialorder %v2140_v0, 0.0  ;;  %v2185_v3 = vmul.f32 0.01, %v2140_v0 }
 0x2d1   : > { %v2200_v6 = vadd.f32 %v2192_v2, %v3224_v22  ;;  %v2195_v11 = vsel %vm2179_vm15, %v2698_v61, %v2187_v63 }
 0x2d2   : > { %2210 = vst.msk [vmem:[%s3388_s7 + $0x10] sm:$0xff] %vm1242_vm2, %v2202_v1  ;;  %v2203_v12 = vadd.f32 %v2195_v11, %v3228_v24  ;;  %v2193_v13 = vsel %vm2177_vm0, %v2140_v0, %v2185_v3 }
 0x2d3   : > { %2208 = vst.msk [vmem:[%s3388_s7] sm:$0xff] %vm1242_vm2, %v2200_v6  ;;  %v2201_v15 = vadd.f32 %v2193_v13, %v3232_v25 }
 0x2d4   : > { %2211 = vst.msk [vmem:[%s3388_s7 + $0x18] sm:$0xff] %vm1242_vm2, %v2203_v12  ;;  %v2701_v26 = vpop.f32.mrb[4].mxu1 }
 0x2d5   : > { %2209 = vst.msk [vmem:[%s3388_s7 + $0x8] sm:$0xff] %vm1242_vm2, %v2201_v15  ;;  %vm2182_vm1 = vcmp.ge.f32.partialorder %v2701_v26, 0.0  ;;  %v2190_v19 = vmul.f32 0.01, %v2701_v26  ;;  %v2153_v37 = vpop.f32.mrb[5].mxu1 }
 0x2d6   : > { %vm2180_vm3 = vcmp.ge.f32.partialorder %v2153_v37, 0.0  ;;  %v2188_v22 = vmul.f32 0.01, %v2153_v37  ;;  %v2702_v39 = vpop.f32.mrb[6].mxu1 }
 0x2d7   : > { %v2198_v24 = vsel %vm2182_vm1, %v2701_v26, %v2190_v19  ;;  %vm2183_vm4 = vcmp.ge.f32.partialorder %v2702_v39, 0.0  ;;  %v2191_v17 = vmul.f32 0.01, %v2702_v39  ;;  %v2156_v4 = vpop.f32.mrb[7].mxu1 }
 0x2d8   : > { %v2206_v25 = vadd.f32 %v2198_v24, %v3236_v33  ;;  %v2196_v5 = vsel %vm2180_vm3, %v2153_v37, %v2188_v22  ;;  %vm2181_vm5 = vcmp.ge.f32.partialorder %v2156_v4, 0.0  ;;  %v2189_v7 = vmul.f32 0.01, %v2156_v4 }
 0x2d9   : > { %v2204_v8 = vadd.f32 %v2196_v5, %v3240_v36  ;;  %v2199_v9 = vsel %vm2183_vm4, %v2702_v39, %v2191_v17 }
 0x2da   : > { %2214 = vst.msk [vmem:[%s3388_s7 + $0x30] sm:$0xff] %vm1242_vm2, %v2206_v25  ;;  %v2207_v10 = vadd.f32 %v2199_v9, %v3246_v41  ;;  %v2197_v14 = vsel %vm2181_vm5, %v2156_v4, %v2189_v7 }
 0x2db   : > { %2212 = vst.msk [vmem:[%s3388_s7 + $0x20] sm:$0xff] %vm1242_vm2, %v2204_v8  ;;  %v2205_v16 = vadd.f32 %v2197_v14, %v3251_v44 }
 0x2dc   : > { %2215 = vst.msk [vmem:[%s3388_s7 + $0x38] sm:$0xff] %vm1242_vm2, %v2207_v10 }
 0x2dd   : > { %2213 = vst.msk [vmem:[%s3388_s7 + $0x28] sm:$0xff] %vm1242_vm2, %v2205_v16 }
 0x2de PF: > { %s16_s21 = sadd.s32 1, %s2865_s21  }
 0x2df   : > { %p13_p4 = scmp.ge.s32.totalorder %s16_s21, 4  }
 0x2e1   :  { %15 = sbr.rel (!%p13_p4) target bundleno = 1 (0x1), region = 103 }

</bundles_post_ra>
